<compile_context>
chip_gen: v7x
topology: tpu7x:2x2x1
jax: 0.10.0
libtpu: 0.0.40
codegen_flags: <defaults>
</compile_context>

<pallas_src>
import functools

import numpy as np

import jax
import jax.numpy as jnp
from jax.experimental import pallas as pl
from jax.experimental.pallas import tpu as pltpu

_LANE = 128


def _phys_vmem_bytes():
    """Physical VMEM per core; keys tile-size heuristics per TPU generation."""
    try:
        info = pltpu.get_tpu_info()
        for attr in ("vmem_capacity_bytes", "vmem_size_bytes", "vmem_bytes"):
            v = getattr(info, attr, None)
            if v:
                return int(v)
    except Exception:
        pass
    return 64 << 20          # conservative default (v7x)


def _layernorm_f32(x, gamma, beta, true_c, eps):
    """One-pass LayerNorm over the last axis.

    Lanes >= true_c are zero padding, so sum(x)/sum(x*x) need no iota mask and
    padded output lanes stay exactly zero (gamma/beta pad lanes are zero).
    """
    inv_c = 1.0 / true_c
    mean = jnp.sum(x, axis=-1, keepdims=True) * inv_c
    mean_sq = jnp.sum(x * x, axis=-1, keepdims=True) * inv_c
    var = mean_sq - mean * mean
    rstd = jax.lax.rsqrt(var + eps)
    return (x - mean) * rstd * gamma + beta


def _saliency_kernel_h1(fea_ref, gamma_ref, beta_ref, wav_ref, bp_ref, out_ref,
                        *, true_c, eps):
    """num_heads == 1 fast path.

    All four (C,C) weight matmuls are folded on the host into one (Cp, 2Cp)
    matrix applied only to the saliency token:
        a = t_norm @ (scale*Wk^T Wq),  vp = t_norm @ (Wv^T Wp^T)
        out = sigmoid(F_norm . a) * vp + b_proj + residual
    """
    bt, n, cp = fea_ref.shape

    # LayerNorm only the rows we use (saliency + patch tokens); skip the unused
    # tail token.  Residual is re-read from the ref below so the f32 copy of
    # the whole input block never has to stay live.
    x = fea_ref[:, : n - 1, :].astype(jnp.float32)
    xn = _layernorm_f32(x, gamma_ref[...], beta_ref[...], true_c, eps)

    t_s = xn[:, 0, :]                                    # (Bt, Cp) saliency token
    f_s = xn[:, 1:, :]                                   # (Bt, M, Cp) patch tokens

    av = jnp.dot(t_s.astype(wav_ref.dtype), wav_ref[...],
                 preferred_element_type=jnp.float32)     # (Bt, 2Cp)
    a = av[:, :cp]
    vp = av[:, cp:]

    logits = jnp.sum(f_s * a[:, None, :], axis=-1, keepdims=True)   # (Bt, M, 1)
    attn = jax.nn.sigmoid(logits)                        # attn_drop = identity (eval)

    res = fea_ref[:, 1 : n - 1, :].astype(jnp.float32)
    out = attn * vp[:, None, :] + bp_ref[...] + res
    out_ref[...] = out.astype(out_ref.dtype)             # proj_drop = identity (eval)


def _saliency_kernel_mh(fea_ref, gamma_ref, beta_ref, wq_ref, wkv_ref, sel_ref,
                        exp_ref, wp_ref, bp_ref, out_ref, *, true_c, eps):
    """General num_heads > 1 path.

    Head mixing lives in a 128-lane head tile: per-head logits come from one
    (rows, Cp) x (Cp, Hp) selector matmul, sigmoid runs on (rows, Hp) only, and
    the result is expanded back with a (Hp, Cp) selector matmul.  Pad channels
    and pad heads carry exact zeros everywhere, so padding never leaks.
    """
    bt, n, cp = fea_ref.shape
    m = n - 2
    rows = bt * m
    cdt = wq_ref.dtype                                   # MXU operand dtype

    x = fea_ref[:, : n - 1, :].astype(jnp.float32)
    xn = _layernorm_f32(x, gamma_ref[...], beta_ref[...], true_c, eps)

    t_s = xn[:, 0, :]                                    # (Bt, Cp)
    f2 = xn[:, 1:, :].reshape(rows, cp)                  # (Bt*M, Cp)

    q = jnp.dot(f2.astype(cdt), wq_ref[...], preferred_element_type=jnp.float32)
    kv = jnp.dot(t_s.astype(cdt), wkv_ref[...], preferred_element_type=jnp.float32)
    k = kv[:, :cp]                                       # scale already folded in
    v = kv[:, cp:]

    prod = (q.reshape(bt, m, cp) * k[:, None, :]).reshape(rows, cp)
    logits_h = jnp.dot(prod.astype(cdt), sel_ref[...],
                       preferred_element_type=jnp.float32)           # (rows, Hp)
    attn_h = jax.nn.sigmoid(logits_h)                    # EUP work on 128 lanes only
    attn = jnp.dot(attn_h.astype(cdt), exp_ref[...],
                   preferred_element_type=jnp.float32)               # (rows, Cp)

    infer = (attn.reshape(bt, m, cp) * v[:, None, :]).reshape(rows, cp)
    proj = jnp.dot(infer.astype(cdt), wp_ref[...],
                   preferred_element_type=jnp.float32) + bp_ref[...]

    res = fea_ref[:, 1 : n - 1, :].astype(jnp.float32)
    out = proj.reshape(bt, m, cp) + res
    out_ref[...] = out.astype(out_ref.dtype)
    # TODO(synk): generalise the h1 fold (contract k into Wq and v into Wp per
    # batch) to drop the remaining two (rows,Cp)x(Cp,Cp) matmuls; needs
    # head-aligned channel padding.


def _pick_block_b(B, N, M, Cp, in_item, weight_bytes, vmem_limit, rows_target,
                  interm_factor):
    """Batch tile chosen against an explicit VMEM budget."""
    per_b = (N * Cp * in_item * 2            # input block, double buffered
             + M * Cp * in_item * 2          # output block, double buffered
             + interm_factor * N * Cp * 4)   # live f32 intermediates (estimate)
    budget = int(0.8 * vmem_limit) - weight_bytes - (1 << 20)
    bb = budget // max(per_b, 1)
    bb = min(bb, max(1, rows_target // max(M, 1)))
    if B >= 2:
        bb = min(bb, -(-B // 2))   # >= 2 grid steps so both v7x TensorCores get work
    return int(max(1, min(bb, B)))


def _pallas_run(kernel, out_shape, grid, make_in_specs, out_spec, cparams, ce, args):
    """Prefer single-buffered constant weight blocks (pl.Buffered(1)); fall back
    to default buffering if this JAX build rejects the pipeline_mode request."""
    try:
        return pl.pallas_call(
            kernel, out_shape=out_shape, grid=grid, in_specs=make_in_specs(True),
            out_specs=out_spec, compiler_params=cparams, cost_estimate=ce)(*args)
    except Exception:
        return pl.pallas_call(
            kernel, out_shape=out_shape, grid=grid, in_specs=make_in_specs(False),
            out_specs=out_spec, compiler_params=cparams, cost_estimate=ce)(*args)


def saliency_token_inference(fea, params, *, num_heads=1, qk_scale=None, eps=1e-5,
                             block_b=None, compute_dtype=jnp.bfloat16):
    """JAX/Pallas equivalent of PyTorch saliency_token_inference.forward.

    NOTE: the host-side weight folds are cheap one-off C^2/C^3 work, but if the
    params are traced (not constant under jit) they should be hoisted so they
    are not re-materialised every call.
    """
    B, N, C = fea.shape
    assert N >= 3, "need saliency token, >=1 patch token, tail token"
    assert C % num_heads == 0, "C must be divisible by num_heads"
    M = N - 2
    head_dim = C // num_heads
    scale = float(qk_scale) if qk_scale is not None else head_dim ** (-0.5)

    f32 = jnp.float32
    wdt = np.dtype(compute_dtype)
    Cp = -(-C // _LANE) * _LANE
    cpad = Cp - C
    in_item = np.dtype(fea.dtype).itemsize

    def pad_mat(w):                    # (C, C) -> (Cp, Cp), zero padded
        return jnp.pad(w.astype(f32), ((0, cpad), (0, cpad)))

    def pad_vec(v):                    # (C,) -> (1, Cp), kept f32 (VALU operands)
        return jnp.pad(v.astype(f32), (0, cpad)).reshape(1, Cp)

    gamma = pad_vec(params["ln_gamma"])
    beta = pad_vec(params["ln_beta"])
    bp = pad_vec(params["bp"])
    wq = params["wq"].astype(f32)
    wk = params["wk"].astype(f32)
    wv = params["wv"].astype(f32)
    wp = params["wp"].astype(f32)

    # TODO(synk): for C not a multiple of 128, pass true-C (full-dim) blocks to
    # skip this pad and the final slice; it is a no-op for production widths.
    fea_p = jnp.pad(fea, ((0, 0), (0, 0), (0, cpad))) if cpad else fea

    phys_vmem = _phys_vmem_bytes()
    vmem_limit = max(32 << 20, min(phys_vmem // 2, 64 << 20))
    rows_target = 512 if phys_vmem <= (64 << 20) else 1024   # smaller tiles on v7x

    if num_heads == 1:
        # Fold the whole q.k chain and the v->proj chain into two matrices that
        # only multiply the (one row per batch) saliency token.
        wa = pad_mat(scale * (wk.T @ wq))
        wvp = pad_mat(wv.T @ wp.T)
        wav = jnp.concatenate([wa, wvp], axis=1).astype(wdt)          # (Cp, 2Cp)
        weights = (wav,)
        wshapes = ((Cp, 2 * Cp),)
        kernel = functools.partial(_saliency_kernel_h1, true_c=C, eps=eps)
        interm_factor = 4
        flops = 4 * B * Cp * Cp + 2 * B * M * Cp + 8 * B * N * Cp
        transc = B * M + B * N
    else:
        Hp = max(_LANE, -(-num_heads // _LANE) * _LANE)
        wq_t = pad_mat(wq.T).astype(wdt)                              # y = x @ W^T
        wkv = jnp.concatenate([pad_mat(wk.T) * scale, pad_mat(wv.T)],
                              axis=1).astype(wdt)                     # (Cp, 2Cp)
        wp_t = pad_mat(wp.T).astype(wdt)
        ch = jnp.arange(Cp)
        hd = jnp.arange(Hp)
        head_of_ch = jnp.where(ch < C, ch // head_dim, -1)            # -1 for pads
        sel = (head_of_ch[:, None] == hd[None, :]).astype(wdt)        # (Cp, Hp)
        expn = sel.T                                                  # (Hp, Cp)
        weights = (wq_t, wkv, sel, expn, wp_t)
        wshapes = ((Cp, Cp), (Cp, 2 * Cp), (Cp, Hp), (Hp, Cp), (Cp, Cp))
        kernel = functools.partial(_saliency_kernel_mh, true_c=C, eps=eps)
        interm_factor = 6
        flops = (4 * B * M * Cp * Cp + 4 * B * M * Cp * Hp
                 + 4 * B * Cp * Cp + 8 * B * N * Cp)
        transc = B * M * Hp + B * N

    weight_bytes = sum(a * b for a, b in wshapes) * wdt.itemsize + 3 * Cp * 4

    if block_b is None:
        block_b = _pick_block_b(B, N, M, Cp, in_item, weight_bytes, vmem_limit,
                                rows_target, interm_factor)
    block_b = int(max(1, min(block_b, B)))
    grid_b = pl.cdiv(B, block_b)
    b_pad = grid_b * block_b - B
    if b_pad:
        # pad the batch with zero rows rather than degrading block_b to a divisor
        fea_p = jnp.pad(fea_p, ((0, b_pad), (0, 0), (0, 0)))
    grid = (grid_b,)

    fea_spec = pl.BlockSpec((block_b, N, Cp), lambda b: (b, 0, 0))
    out_spec = pl.BlockSpec((block_b, M, Cp), lambda b: (b, 0, 0))
    out_shape = jax.ShapeDtypeStruct((B + b_pad, M, Cp), fea.dtype)

    def make_in_specs(single_buffer):
        def const_spec(shape):
            if single_buffer:
                return pl.BlockSpec(shape, lambda b: (0, 0),
                                    pipeline_mode=pl.Buffered(1))
            return pl.BlockSpec(shape, lambda b: (0, 0))
        vec = const_spec((1, Cp))
        return ([fea_spec, const_spec((1, Cp)), const_spec((1, Cp))]
                + [const_spec(s) for s in wshapes] + [vec])

    bytes_acc = (B * N * Cp + B * M * Cp) * in_item + weight_bytes
    ce = pl.CostEstimate(flops=int(flops), transcendentals=int(transc),
                         bytes_accessed=int(bytes_acc))
    cparams = pltpu.CompilerParams(dimension_semantics=("parallel",),
                                   vmem_limit_bytes=int(vmem_limit))

    args = (fea_p, gamma, beta) + weights + (bp,)
    out = _pallas_run(kernel, out_shape, grid, make_in_specs, out_spec, cparams,
                      ce, args)

    if b_pad or cpad:
        out = out[:B, :, :C]
    return out


def _reference(fea, params, *, num_heads=1, qk_scale=None, eps=1e-5):
    """Pure-JAX reference mirroring the PyTorch forward, for validation."""
    B, N, C = fea.shape
    head_dim = C // num_heads
    scale = qk_scale if qk_scale is not None else head_dim ** (-0.5)

    mean = jnp.mean(fea, axis=-1, keepdims=True)
    var = jnp.mean((fea - mean) ** 2, axis=-1, keepdims=True)
    x = (fea - mean) / jnp.sqrt(var + eps) * params["ln_gamma"] + params["ln_beta"]

    t_s = x[:, 0:1, :]
    f_s = x[:, 1:-1, :]
    q = jnp.einsum("bmc,dc->bmd", f_s, params["wq"])
    k = jnp.einsum("bmc,dc->bmd", t_s, params["wk"])
    v = jnp.einsum("bmc,dc->bmd", t_s, params["wv"])

    q = q.reshape(B, N - 2, num_heads, head_dim).transpose(0, 2, 1, 3)
    k = k.reshape(B, 1, num_heads, head_dim).transpose(0, 2, 1, 3)
    v = v.reshape(B, 1, num_heads, head_dim).transpose(0, 2, 1, 3)

    attn = jnp.einsum("bhmd,bhkd->bhmk", q, k) * scale
    attn = jax.nn.sigmoid(attn)
    infer = jnp.einsum("bhmk,bhkd->bhmd", attn, v)
    infer = infer.transpose(0, 2, 1, 3).reshape(B, N - 2, C)
    infer = jnp.einsum("bmc,dc->bmd", infer, params["wp"]) + params["bp"]
    return infer + fea[:, 1:-1, :]


if __name__ == "__main__":
    B, N, C = 2, 18, 32        # token 0 = saliency token, token N-1 = tail token
    key = jax.random.PRNGKey(0)
    k_fea, k_g, k_be, k_q, k_k, k_v, k_p, k_b, k_f3 = jax.random.split(key, 9)

    fea = jax.random.normal(k_fea, (B, N, C), jnp.float32)
    params = {
        "ln_gamma": 1.0 + 0.1 * jax.random.normal(k_g, (C,), jnp.float32),
        "ln_beta": 0.05 * jax.random.normal(k_be, (C,), jnp.float32),
        "wq": jax.random.normal(k_q, (C, C), jnp.float32) * 0.05,
        "wk": jax.random.normal(k_k, (C, C), jnp.float32) * 0.05,
        "wv": jax.random.normal(k_v, (C, C), jnp.float32) * 0.05,
        "wp": jax.random.normal(k_p, (C, C), jnp.float32) * 0.05,
        "bp": jax.random.normal(k_b, (C,), jnp.float32) * 0.01,
    }

    configs = [
        dict(num_heads=1),                                # bf16 fused fast path
        dict(num_heads=1, compute_dtype=jnp.float32),     # f32, tight tolerance
        dict(num_heads=1, block_b=1),                     # explicit batch tiling
        dict(num_heads=2),                                # multi-head, head tile
        dict(num_heads=2, compute_dtype=jnp.float32),
    ]
    for cfg in configs:
        out = jax.block_until_ready(saliency_token_inference(fea, params, **cfg))
        ref = _reference(fea, params, num_heads=cfg["num_heads"])
        assert out.shape == (B, N - 2, C)
        tol = 1e-3 if cfg.get("compute_dtype") is jnp.float32 else 3e-2
        err = float(jnp.max(jnp.abs(out - ref)))
        assert err < tol, f"mismatch vs pure-JAX reference for {cfg}: {err}"

    # Odd batch: exercises the batch-padding path (B padded to a block multiple).
    fea3 = jax.random.normal(k_f3, (3, N, C), jnp.float32)
    out3 = jax.block_until_ready(saliency_token_inference(fea3, params, num_heads=1))
    ref3 = _reference(fea3, params, num_heads=1)
    err3 = float(jnp.max(jnp.abs(out3 - ref3)))
    assert out3.shape == (3, N - 2, C)
    assert err3 < 3e-2, f"mismatch on odd-batch path: {err3}"

    print("KERNEL_OK")
</pallas_src>

<mosaic_0001>
module attributes {stable_mosaic.version = 11 : i64} {
  func.func @_saliency_kernel_h1(%arg0: i32, %arg1: memref<1x18x128xf32, #tpu.memory_space<vmem>>, %arg2: memref<1x128xf32, #tpu.memory_space<vmem>>, %arg3: memref<1x128xf32, #tpu.memory_space<vmem>>, %arg4: memref<128x256xbf16, #tpu.memory_space<vmem>>, %arg5: memref<1x128xf32, #tpu.memory_space<vmem>>, %arg6: memref<1x16x128xf32, #tpu.memory_space<vmem>>) attributes {dimension_semantics = [#tpu.dimension_semantics<parallel>], iteration_bounds = array<i64: 2>, scalar_prefetch = 0 : i64, scratch_operands = 0 : i64, tpu.core_type = #tpu.core_type<tc>, window_params = [{transform_indices = @transform_0, window_bounds = array<i64: 1, 18, 128>}, {pipeline_mode = #tpu.pipeline_mode<synchronous>, transform_indices = @transform_1, window_bounds = array<i64: 1, 128>}, {pipeline_mode = #tpu.pipeline_mode<synchronous>, transform_indices = @transform_2, window_bounds = array<i64: 1, 128>}, {pipeline_mode = #tpu.pipeline_mode<synchronous>, transform_indices = @transform_3, window_bounds = array<i64: 128, 256>}, {pipeline_mode = #tpu.pipeline_mode<synchronous>, transform_indices = @transform_4, window_bounds = array<i64: 1, 128>}, {transform_indices = @transform_5, window_bounds = array<i64: 1, 16, 128>}]} {
    %c0 = arith.constant 0 : index
    %c0_0 = arith.constant 0 : index
    %c0_1 = arith.constant 0 : index
    %0 = vector.load %arg1[%c0, %c0_0, %c0_1] : memref<1x18x128xf32, #tpu.memory_space<vmem>>, vector<1x17x128xf32>
    %c0_2 = arith.constant 0 : index
    %c0_3 = arith.constant 0 : index
    %1 = vector.load %arg2[%c0_2, %c0_3] : memref<1x128xf32, #tpu.memory_space<vmem>>, vector<1x128xf32>
    %c0_4 = arith.constant 0 : index
    %c0_5 = arith.constant 0 : index
    %2 = vector.load %arg3[%c0_4, %c0_5] : memref<1x128xf32, #tpu.memory_space<vmem>>, vector<1x128xf32>
    %cst = arith.constant dense<0.000000e+00> : vector<1x17xf32>
    %3 = vector.multi_reduction <add>, %0, %cst [2] : vector<1x17x128xf32> to vector<1x17xf32>
    %4 = vector.shape_cast %3 : vector<1x17xf32> to vector<1x17x1xf32>
    %cst_6 = arith.constant 3.125000e-02 : f32
    %5 = vector.broadcast %cst_6 : f32 to vector<1x17x1xf32>
    %6 = arith.mulf %4, %5 : vector<1x17x1xf32>
    %7 = arith.mulf %0, %0 : vector<1x17x128xf32>
    %cst_7 = arith.constant dense<0.000000e+00> : vector<1x17xf32>
    %8 = vector.multi_reduction <add>, %7, %cst_7 [2] : vector<1x17x128xf32> to vector<1x17xf32>
    %9 = vector.shape_cast %8 : vector<1x17xf32> to vector<1x17x1xf32>
    %cst_8 = arith.constant 3.125000e-02 : f32
    %10 = vector.broadcast %cst_8 : f32 to vector<1x17x1xf32>
    %11 = arith.mulf %9, %10 : vector<1x17x1xf32>
    %12 = arith.mulf %6, %6 : vector<1x17x1xf32>
    %13 = arith.subf %11, %12 : vector<1x17x1xf32>
    %cst_9 = arith.constant 9.99999974E-6 : f32
    %14 = vector.broadcast %cst_9 : f32 to vector<1x17x1xf32>
    %15 = arith.addf %13, %14 : vector<1x17x1xf32>
    %16 = math.rsqrt %15 : vector<1x17x1xf32>
    %17 = vector.broadcast %6 : vector<1x17x1xf32> to vector<1x17x128xf32>
    %18 = arith.subf %0, %17 : vector<1x17x128xf32>
    %19 = vector.broadcast %16 : vector<1x17x1xf32> to vector<1x17x128xf32>
    %20 = arith.mulf %18, %19 : vector<1x17x128xf32>
    %21 = vector.shape_cast %1 : vector<1x128xf32> to vector<1x1x128xf32>
    %22 = vector.broadcast %21 : vector<1x1x128xf32> to vector<1x17x128xf32>
    %23 = arith.mulf %20, %22 : vector<1x17x128xf32>
    %24 = vector.shape_cast %2 : vector<1x128xf32> to vector<1x1x128xf32>
    %25 = vector.broadcast %24 : vector<1x1x128xf32> to vector<1x17x128xf32>
    %26 = arith.addf %23, %25 : vector<1x17x128xf32>
    %27 = vector.extract_strided_slice %26 {offsets = [0, 0, 0], sizes = [1, 1, 128], strides = [1, 1, 1]} : vector<1x17x128xf32> to vector<1x1x128xf32>
    %28 = vector.shape_cast %27 : vector<1x1x128xf32> to vector<1x128xf32>
    %29 = vector.extract_strided_slice %26 {offsets = [0, 1, 0], sizes = [1, 16, 128], strides = [1, 1, 1]} : vector<1x17x128xf32> to vector<1x16x128xf32>
    %30 = arith.truncf %28 : vector<1x128xf32> to vector<1x128xbf16>
    %c0_10 = arith.constant 0 : index
    %c0_11 = arith.constant 0 : index
    %31 = vector.load %arg4[%c0_10, %c0_11] : memref<128x256xbf16, #tpu.memory_space<vmem>>, vector<128x256xbf16>
    %cst_12 = arith.constant dense<0.000000e+00> : vector<1x256xf32>
    %32 = tpu.matmul %30, %31, %cst_12 {dimension_numbers = #tpu.dot_dimension_numbers<[1], [0], [0], [1], [0, 0, 1, 1], [], []>} : vector<1x128xbf16>, vector<128x256xbf16>, vector<1x256xf32> -> vector<1x256xf32>
    %33 = vector.extract_strided_slice %32 {offsets = [0, 0], sizes = [1, 128], strides = [1, 1]} : vector<1x256xf32> to vector<1x128xf32>
    %34 = vector.extract_strided_slice %32 {offsets = [0, 128], sizes = [1, 128], strides = [1, 1]} : vector<1x256xf32> to vector<1x128xf32>
    %35 = vector.shape_cast %33 : vector<1x128xf32> to vector<1x1x128xf32>
    %36 = vector.broadcast %35 : vector<1x1x128xf32> to vector<1x16x128xf32>
    %37 = arith.mulf %29, %36 : vector<1x16x128xf32>
    %cst_13 = arith.constant dense<0.000000e+00> : vector<1x16xf32>
    %38 = vector.multi_reduction <add>, %37, %cst_13 [2] : vector<1x16x128xf32> to vector<1x16xf32>
    %39 = vector.shape_cast %38 : vector<1x16xf32> to vector<1x16x1xf32>
    %40 = arith.negf %39 : vector<1x16x1xf32>
    %41 = math.exp %40 : vector<1x16x1xf32>
    %cst_14 = arith.constant 1.000000e+00 : f32
    %42 = vector.broadcast %cst_14 : f32 to vector<1x16x1xf32>
    %43 = arith.addf %42, %41 : vector<1x16x1xf32>
    %44 = arith.divf %42, %43 : vector<1x16x1xf32>
    %c0_15 = arith.constant 0 : index
    %c1 = arith.constant 1 : index
    %c0_16 = arith.constant 0 : index
    %45 = vector.load %arg1[%c0_15, %c1, %c0_16] : memref<1x18x128xf32, #tpu.memory_space<vmem>>, vector<1x16x128xf32>
    %46 = vector.shape_cast %34 : vector<1x128xf32> to vector<1x1x128xf32>
    %47 = vector.broadcast %44 : vector<1x16x1xf32> to vector<1x16x128xf32>
    %48 = vector.broadcast %46 : vector<1x1x128xf32> to vector<1x16x128xf32>
    %49 = arith.mulf %47, %48 : vector<1x16x128xf32>
    %c0_17 = arith.constant 0 : index
    %c0_18 = arith.constant 0 : index
    %50 = vector.load %arg5[%c0_17, %c0_18] : memref<1x128xf32, #tpu.memory_space<vmem>>, vector<1x128xf32>
    %51 = vector.shape_cast %50 : vector<1x128xf32> to vector<1x1x128xf32>
    %52 = vector.broadcast %51 : vector<1x1x128xf32> to vector<1x16x128xf32>
    %53 = arith.addf %49, %52 : vector<1x16x128xf32>
    %54 = arith.addf %53, %45 : vector<1x16x128xf32>
    %c0_19 = arith.constant 0 : index
    %c0_20 = arith.constant 0 : index
    %c0_21 = arith.constant 0 : index
    %55 = vector.load %arg6[%c0_19, %c0_20, %c0_21] : memref<1x16x128xf32, #tpu.memory_space<vmem>>, vector<1x16x128xf32>
    tpu.vector_store %arg6[%c0_19, %c0_20, %c0_21], %54 {strides = array<i32>} : memref<1x16x128xf32, #tpu.memory_space<vmem>>, vector<1x16x128xf32>,
    return
  }
  func.func @transform_0(%arg0: i32) -> (i32, i32, i32) {
    %c0_i32 = arith.constant 0 : i32
    %c0_i32_0 = arith.constant 0 : i32
    %c0_i32_1 = arith.constant 0 : i32
    return %arg0, %c0_i32, %c0_i32_0 : i32, i32, i32
  }
  func.func @transform_1(%arg0: i32) -> (i32, i32) {
    %c0_i32 = arith.constant 0 : i32
    %c0_i32_0 = arith.constant 0 : i32
    %c0_i32_1 = arith.constant 0 : i32
    return %c0_i32, %c0_i32_0 : i32, i32
  }
  func.func @transform_2(%arg0: i32) -> (i32, i32) {
    %c0_i32 = arith.constant 0 : i32
    %c0_i32_0 = arith.constant 0 : i32
    %c0_i32_1 = arith.constant 0 : i32
    return %c0_i32, %c0_i32_0 : i32, i32
  }
  func.func @transform_3(%arg0: i32) -> (i32, i32) {
    %c0_i32 = arith.constant 0 : i32
    %c0_i32_0 = arith.constant 0 : i32
    %c0_i32_1 = arith.constant 0 : i32
    return %c0_i32, %c0_i32_0 : i32, i32
  }
  func.func @transform_4(%arg0: i32) -> (i32, i32) {
    %c0_i32 = arith.constant 0 : i32
    %c0_i32_0 = arith.constant 0 : i32
    %c0_i32_1 = arith.constant 0 : i32
    return %c0_i32, %c0_i32_0 : i32, i32
  }
  func.func @transform_5(%arg0: i32) -> (i32, i32, i32) {
    %c0_i32 = arith.constant 0 : i32
    %c0_i32_0 = arith.constant 0 : i32
    %c0_i32_1 = arith.constant 0 : i32
    return %arg0, %c0_i32, %c0_i32_0 : i32, i32, i32
  }
}

module attributes {stable_mosaic.version = 11 : i64} {
  func.func @_saliency_kernel_h1(%arg0: i32, %arg1: memref<1x18x128xf32, #tpu.memory_space<vmem>>, %arg2: memref<1x128xf32, #tpu.memory_space<vmem>>, %arg3: memref<1x128xf32, #tpu.memory_space<vmem>>, %arg4: memref<128x256xbf16, #tpu.memory_space<vmem>>, %arg5: memref<1x128xf32, #tpu.memory_space<vmem>>, %arg6: memref<1x16x128xf32, #tpu.memory_space<vmem>>) attributes {dimension_semantics = [#tpu.dimension_semantics<parallel>], iteration_bounds = array<i64: 2>, scalar_prefetch = 0 : i64, scratch_operands = 0 : i64, tpu.core_type = #tpu.core_type<tc>, window_params = [{transform_indices = @transform_0, window_bounds = array<i64: 1, 18, 128>}, {pipeline_mode = #tpu.pipeline_mode<synchronous>, transform_indices = @transform_1, window_bounds = array<i64: 1, 128>}, {pipeline_mode = #tpu.pipeline_mode<synchronous>, transform_indices = @transform_2, window_bounds = array<i64: 1, 128>}, {pipeline_mode = #tpu.pipeline_mode<synchronous>, transform_indices = @transform_3, window_bounds = array<i64: 128, 256>}, {pipeline_mode = #tpu.pipeline_mode<synchronous>, transform_indices = @transform_4, window_bounds = array<i64: 1, 128>}, {transform_indices = @transform_5, window_bounds = array<i64: 1, 16, 128>}]} {
    %c0 = arith.constant 0 : index
    %c0_0 = arith.constant 0 : index
    %c0_1 = arith.constant 0 : index
    %0 = vector.load %arg1[%c0, %c0_0, %c0_1] : memref<1x18x128xf32, #tpu.memory_space<vmem>>, vector<1x17x128xf32>
    %c0_2 = arith.constant 0 : index
    %c0_3 = arith.constant 0 : index
    %1 = vector.load %arg2[%c0_2, %c0_3] : memref<1x128xf32, #tpu.memory_space<vmem>>, vector<1x128xf32>
    %c0_4 = arith.constant 0 : index
    %c0_5 = arith.constant 0 : index
    %2 = vector.load %arg3[%c0_4, %c0_5] : memref<1x128xf32, #tpu.memory_space<vmem>>, vector<1x128xf32>
    %cst = arith.constant dense<0.000000e+00> : vector<1x17xf32>
    %3 = vector.multi_reduction <add>, %0, %cst [2] : vector<1x17x128xf32> to vector<1x17xf32>
    %4 = vector.shape_cast %3 : vector<1x17xf32> to vector<1x17x1xf32>
    %cst_6 = arith.constant 3.125000e-02 : f32
    %5 = vector.broadcast %cst_6 : f32 to vector<1x17x1xf32>
    %6 = arith.mulf %4, %5 : vector<1x17x1xf32>
    %7 = arith.mulf %0, %0 : vector<1x17x128xf32>
    %cst_7 = arith.constant dense<0.000000e+00> : vector<1x17xf32>
    %8 = vector.multi_reduction <add>, %7, %cst_7 [2] : vector<1x17x128xf32> to vector<1x17xf32>
    %9 = vector.shape_cast %8 : vector<1x17xf32> to vector<1x17x1xf32>
    %cst_8 = arith.constant 3.125000e-02 : f32
    %10 = vector.broadcast %cst_8 : f32 to vector<1x17x1xf32>
    %11 = arith.mulf %9, %10 : vector<1x17x1xf32>
    %12 = arith.mulf %6, %6 : vector<1x17x1xf32>
    %13 = arith.subf %11, %12 : vector<1x17x1xf32>
    %cst_9 = arith.constant 9.99999974E-6 : f32
    %14 = vector.broadcast %cst_9 : f32 to vector<1x17x1xf32>
    %15 = arith.addf %13, %14 : vector<1x17x1xf32>
    %16 = math.rsqrt %15 : vector<1x17x1xf32>
    %17 = vector.broadcast %6 : vector<1x17x1xf32> to vector<1x17x128xf32>
    %18 = arith.subf %0, %17 : vector<1x17x128xf32>
    %19 = vector.broadcast %16 : vector<1x17x1xf32> to vector<1x17x128xf32>
    %20 = arith.mulf %18, %19 : vector<1x17x128xf32>
    %21 = vector.shape_cast %1 : vector<1x128xf32> to vector<1x1x128xf32>
    %22 = vector.broadcast %21 : vector<1x1x128xf32> to vector<1x17x128xf32>
    %23 = arith.mulf %20, %22 : vector<1x17x128xf32>
    %24 = vector.shape_cast %2 : vector<1x128xf32> to vector<1x1x128xf32>
    %25 = vector.broadcast %24 : vector<1x1x128xf32> to vector<1x17x128xf32>
    %26 = arith.addf %23, %25 : vector<1x17x128xf32>
    %27 = vector.extract_strided_slice %26 {offsets = [0, 0, 0], sizes = [1, 1, 128], strides = [1, 1, 1]} : vector<1x17x128xf32> to vector<1x1x128xf32>
    %28 = vector.shape_cast %27 : vector<1x1x128xf32> to vector<1x128xf32>
    %29 = vector.extract_strided_slice %26 {offsets = [0, 1, 0], sizes = [1, 16, 128], strides = [1, 1, 1]} : vector<1x17x128xf32> to vector<1x16x128xf32>
    %30 = arith.truncf %28 : vector<1x128xf32> to vector<1x128xbf16>
    %c0_10 = arith.constant 0 : index
    %c0_11 = arith.constant 0 : index
    %31 = vector.load %arg4[%c0_10, %c0_11] : memref<128x256xbf16, #tpu.memory_space<vmem>>, vector<128x256xbf16>
    %cst_12 = arith.constant dense<0.000000e+00> : vector<1x256xf32>
    %32 = tpu.matmul %30, %31, %cst_12 {dimension_numbers = #tpu.dot_dimension_numbers<[1], [0], [0], [1], [0, 0, 1, 1], [], []>} : vector<1x128xbf16>, vector<128x256xbf16>, vector<1x256xf32> -> vector<1x256xf32>
    %33 = vector.extract_strided_slice %32 {offsets = [0, 0], sizes = [1, 128], strides = [1, 1]} : vector<1x256xf32> to vector<1x128xf32>
    %34 = vector.extract_strided_slice %32 {offsets = [0, 128], sizes = [1, 128], strides = [1, 1]} : vector<1x256xf32> to vector<1x128xf32>
    %35 = vector.shape_cast %33 : vector<1x128xf32> to vector<1x1x128xf32>
    %36 = vector.broadcast %35 : vector<1x1x128xf32> to vector<1x16x128xf32>
    %37 = arith.mulf %29, %36 : vector<1x16x128xf32>
    %cst_13 = arith.constant dense<0.000000e+00> : vector<1x16xf32>
    %38 = vector.multi_reduction <add>, %37, %cst_13 [2] : vector<1x16x128xf32> to vector<1x16xf32>
    %39 = vector.shape_cast %38 : vector<1x16xf32> to vector<1x16x1xf32>
    %40 = arith.negf %39 : vector<1x16x1xf32>
    %41 = math.exp %40 : vector<1x16x1xf32>
    %cst_14 = arith.constant 1.000000e+00 : f32
    %42 = vector.broadcast %cst_14 : f32 to vector<1x16x1xf32>
    %43 = arith.addf %42, %41 : vector<1x16x1xf32>
    %44 = arith.divf %42, %43 : vector<1x16x1xf32>
    %c0_15 = arith.constant 0 : index
    %c1 = arith.constant 1 : index
    %c0_16 = arith.constant 0 : index
    %45 = vector.load %arg1[%c0_15, %c1, %c0_16] : memref<1x18x128xf32, #tpu.memory_space<vmem>>, vector<1x16x128xf32>
    %46 = vector.shape_cast %34 : vector<1x128xf32> to vector<1x1x128xf32>
    %47 = vector.broadcast %44 : vector<1x16x1xf32> to vector<1x16x128xf32>
    %48 = vector.broadcast %46 : vector<1x1x128xf32> to vector<1x16x128xf32>
    %49 = arith.mulf %47, %48 : vector<1x16x128xf32>
    %c0_17 = arith.constant 0 : index
    %c0_18 = arith.constant 0 : index
    %50 = vector.load %arg5[%c0_17, %c0_18] : memref<1x128xf32, #tpu.memory_space<vmem>>, vector<1x128xf32>
    %51 = vector.shape_cast %50 : vector<1x128xf32> to vector<1x1x128xf32>
    %52 = vector.broadcast %51 : vector<1x1x128xf32> to vector<1x16x128xf32>
    %53 = arith.addf %49, %52 : vector<1x16x128xf32>
    %54 = arith.addf %53, %45 : vector<1x16x128xf32>
    %c0_19 = arith.constant 0 : index
    %c0_20 = arith.constant 0 : index
    %c0_21 = arith.constant 0 : index
    %55 = vector.load %arg6[%c0_19, %c0_20, %c0_21] : memref<1x16x128xf32, #tpu.memory_space<vmem>>, vector<1x16x128xf32>
    tpu.vector_store %arg6[%c0_19, %c0_20, %c0_21], %54 {strides = array<i32>} : memref<1x16x128xf32, #tpu.memory_space<vmem>>, vector<1x16x128xf32>,
    return
  }
  func.func @transform_0(%arg0: i32) -> (i32, i32, i32) {
    %c0_i32 = arith.constant 0 : i32
    %c0_i32_0 = arith.constant 0 : i32
    %c0_i32_1 = arith.constant 0 : i32
    return %arg0, %c0_i32, %c0_i32_0 : i32, i32, i32
  }
  func.func @transform_1(%arg0: i32) -> (i32, i32) {
    %c0_i32 = arith.constant 0 : i32
    %c0_i32_0 = arith.constant 0 : i32
    %c0_i32_1 = arith.constant 0 : i32
    return %c0_i32, %c0_i32_0 : i32, i32
  }
  func.func @transform_2(%arg0: i32) -> (i32, i32) {
    %c0_i32 = arith.constant 0 : i32
    %c0_i32_0 = arith.constant 0 : i32
    %c0_i32_1 = arith.constant 0 : i32
    return %c0_i32, %c0_i32_0 : i32, i32
  }
  func.func @transform_3(%arg0: i32) -> (i32, i32) {
    %c0_i32 = arith.constant 0 : i32
    %c0_i32_0 = arith.constant 0 : i32
    %c0_i32_1 = arith.constant 0 : i32
    return %c0_i32, %c0_i32_0 : i32, i32
  }
  func.func @transform_4(%arg0: i32) -> (i32, i32) {
    %c0_i32 = arith.constant 0 : i32
    %c0_i32_0 = arith.constant 0 : i32
    %c0_i32_1 = arith.constant 0 : i32
    return %c0_i32, %c0_i32_0 : i32, i32
  }
  func.func @transform_5(%arg0: i32) -> (i32, i32, i32) {
    %c0_i32 = arith.constant 0 : i32
    %c0_i32_0 = arith.constant 0 : i32
    %c0_i32_1 = arith.constant 0 : i32
    return %arg0, %c0_i32, %c0_i32_0 : i32, i32, i32
  }
}

</mosaic_0001>

<bundles_post_ra>
// kernel: tpu_custom_call.1
= control target key start
LH: loop header
LB: loop body
LE: loop exit
PB: predicated region body
PF: predicated region fallthrough
CT: control target
= control target key end

     0   :  { %10 = vsyncpa [#allocation3], 0  ;;  %s1022_s0 = inlined_call_operand.vmem [shape: f32[2,18,128], index: 0, kind: input, shape index: {}]   ;;  %s1023_s1 = inlined_call_operand.vmem [shape: f32[1,128], index: 1, kind: input, shape index: {}]   ;;  %s1024_s2 = inlined_call_operand.vmem [shape: f32[1,128], index: 2, kind: input, shape index: {}]   ;;  %s1025_s3 = inlined_call_operand.hbm [shape: bf16[128,256], index: 3, kind: input, shape index: {}]   ;;  %s1026_s4 = inlined_call_operand.vmem [shape: f32[1,128], index: 4, kind: input, shape index: {}]   ;;  %s1027_s5 = inlined_call_operand.hbm [shape: f32[2,16,128], index: 5, kind: output, shape index: {}]  }
   0x1   :  { %11 = vsyncpa [#allocation4], 0 }
   0x2   :  { %13 = vsyncpa [#allocation4 + $0x1], 0  ;;  %s864_s18 = smov 0   ;;  %s866_s19 = smov 0  }
   0x3   :  { %s868_s20 = smov 0   ;;  %s870_s21 = smov 0  }
   0x4 LB: > { %s885_s22 = sadd.s32 4294967295, %s825_s21   ;;  %s597_s23 = sadd.s32 4294967294, %s825_s21   ;;  %s825_s21 = sphi %s870_s21, %s1043_s21   ;;  %s821_s20 = sphi %s868_s20, %s1042_s20   ;;  %s817_s19 = sphi %s866_s19, %s1041_s19   ;;  %s813_s18 = sphi %s864_s18, %s1040_s18  }
   0x5   : > { %s889_s24 = sadd.s32 1, %s825_s21   ;;  %s136_s25 = sadd.s32 1, %s821_s20 }
   0x6   : > { %s133_s26 = ssub.s32 %s825_s21, %s889_s24  ;;  %p146_p0 = scmp.ne.s32.totalorder %s821_s20, %s817_s19 }
   0x7   : > { %p134_p1 = scmp.eq.s32.totalorder %s133_s26, 0  ;;  %p147_p2 = scmp.eq.s32.totalorder %s885_s22, 1 }
   0x8   : > { %p152_p3 = scmp.ne.s32.totalorder %s817_s19, %s813_s18  ;;  %p153_p4 = scmp.eq.s32.totalorder %s597_s23, 1 }
   0x9   : > { %s900_s27 = scalar_select %p134_p1, %s821_s20, %s136_s25  }
   0xa   : > { %p902_p5 = por %p147_p2, %p146_p0  ;;  %p906_p6 = por %p153_p4, %p152_p3 }
   0xb   : > { %p598_p7 = scmp.ge.s32.totalorder %s825_s21, 1  ;;  %p160_p8 = scmp.lt.s32.totalorder %s825_s21, 3 }
   0xc   : > { %s1031_s28 = scalar_select %p902_p5, 1, 0 }
   0xd   : > { %s1032_s29 = scalar_select %p906_p6, 1, 0 }
   0xe   : > { %p1028_p9 = scmp.eq.s32.totalorder %s885_s22, 0  ;;  %p913_p10 = pnand %p598_p7, %p160_p8 }
   0xf   : > { %s827_s6 = smov [#allocation2]   ;;  %s731_s11 = scalar_lea.hbm %s1025_s3, 2048 }
  0x10   : > { %s1033_s30 = scalar_select %p913_p10, 1, 0 }
  0x11   : > { %s178_s7 = sshll.u32 %s827_s6, 4  ;;  %p640_p11 = pneg %p913_p10  ;;  %s179_s7 = int_to_ptr.vmem [resolvable:$true] %s178_s7 }
  0x12   : > { %p732_p13 = scmp.ne.s32.totalorder %s1025_s3, %s731_s11  ;;  %p738_p3 = scmp.lt.u32.totalorder %s731_s11, %s1025_s3 }
  0x13   : > { %p921_p12 = pnand %p1028_p9, %p640_p11 }
  0x15   : > { %p733_p0 = pneg %p921_p12 }
  0x17   : > { %p734_p1 = pnand %p733_p0, %p732_p13 }
  0x19   : > { %p735_p2 = pneg %p734_p1 }
  0x1b   : > { %p740_p4 = pnand %p738_p3, %p735_p2 }
  0x1d   : > { %743 = shalt.err (!%p740_p4)
}
  0x1e   : > { %s744_s16 = scalar_lea.vmem %s179_s7, 2048  ;;  %p752_p9 = scmp.lt.s32.totalorder %s179_s7, %s179_s7 }
  0x1f   : > { %p745_p7 = scmp.ne.s32.totalorder %s179_s7, %s744_s16  ;;  %p753_p6 = scmp.lt.s32.totalorder %s744_s16, %s744_s16 }
  0x21   : > { %p747_p8 = pnand %p745_p7, %p733_p0  ;;  %p754_p5 = por %p753_p6, %p752_p9 }
  0x23   : > { %p748_p11 = pneg %p747_p8 }
  0x25   : > { %p755_p10 = pnand %p754_p5, %p748_p11 }
  0x27   : > { %758 = shalt.err (!%p755_p10)
}
  0x28   : > { %s828_s17 = smov 128   ;;  %s829_s23 = smov 8  }
  0x29   : > { %643 = dma.hbm_to_vmem [thread:$0]  (!%p921_p12), %s1025_s3, 2048, %s179_s7, [#allocation3], %s828_s17, %s828_s17, %s829_s23  }
  0x2a   : > { %p1035_p13 = scmp.ne.s32.totalorder %s1033_s30, 0 }
  0x2b   : > { %p1036_p1 = scmp.eq.s32.totalorder (!%p1035_p13), %s885_s22, 0 }
  0x2c   : > { %205 = sbr.rel (%p1035_p13) target bundleno = 641 (0x281), region = 40 }
  0x33   : > { %804 = dma.done.wait (%p1036_p1), [#allocation3], 2048   ;;  %p1037_p0 = pmov %p1036_p1 }
  0x34   : > { %p233_p5 = scmp.lt.s32.totalorder %s885_s22, 1  ;;  %v689_v2 = vld [vmem:[#allocation2 + $0x4] ss:$8 sps:$4 sm:$0xff]   ;;  %v691_v3 = vld [vmem:[#allocation2] ss:$8 sps:$4 sm:$0xff]   ;;  %v830_v13 = vmov 0   ;;  %v442_v55 = vlaneseq }
  0x35   : > { %806 = vsyncadd (%p1037_p0), [#allocation3], 4294965248  ;;  %401 = vmatprep.subr.bf16.mxu0 %v689_v2  ;;  %v692_v4 = vld [vmem:[#allocation2 + $0x14] ss:$8 sps:$4 sm:$0xff]   ;;  %v694_v5 = vld [vmem:[#allocation2 + $0x10] ss:$8 sps:$4 sm:$0xff]   ;;  %433 = vmatprep.mubr.bf16.mxu0 %v830_v13 }
  0x36   : > { %s234_s6 = scalar_select %p233_p5, %s885_s22, 1  ;;  %402 = vmatpush1.bf16.msra.mxu0 %v691_v3  ;;  %v695_v6 = vld [vmem:[#allocation2 + $0x24] ss:$8 sps:$4 sm:$0xff]   ;;  %v697_v7 = vld [vmem:[#allocation2 + $0x20] ss:$8 sps:$4 sm:$0xff]   ;;  %vm248_vm0 = vcmask 1040384  }
  0x37   : > { %403 = vmatprep.subr.bf16.mxu0 %v692_v4  ;;  %v698_v8 = vld [vmem:[#allocation2 + $0x34] ss:$8 sps:$4 sm:$0xff]   ;;  %v700_v9 = vld [vmem:[#allocation2 + $0x30] ss:$8 sps:$4 sm:$0xff]   ;;  %v701_v10 = vld [vmem:[#allocation2 + $0x44] ss:$8 sps:$4 sm:$0xff]  }
  0x38   : > { %s633_s9 = smul.u32 24, %s234_s6  ;;  %v703_v11 = vld [vmem:[#allocation2 + $0x40] ss:$8 sps:$4 sm:$0xff]   ;;  %v704_v12 = vld [vmem:[#allocation2 + $0x54] ss:$8 sps:$4 sm:$0xff]   ;;  %v443_v59 = vshrl.u32 %v442_v55, 7 }
  0x39   : > { %v706_v14 = vld [vmem:[#allocation2 + $0x50] ss:$8 sps:$4 sm:$0xff]   ;;  %v707_v15 = vld [vmem:[#allocation2 + $0x64] ss:$8 sps:$4 sm:$0xff]   ;;  %v709_v16 = vld [vmem:[#allocation2 + $0x60] ss:$8 sps:$4 sm:$0xff]  }
  0x3a   : > { %s952_s11 = scalar_lea.vmem %s1022_s0, %s633_s9  ;;  %404 = vmatpush1.bf16.msra.mxu0 %v694_v5  ;;  %v710_v17 = vld [vmem:[#allocation2 + $0x74] ss:$8 sps:$4 sm:$0xff]   ;;  %v712_v18 = vld [vmem:[#allocation2 + $0x70] ss:$8 sps:$4 sm:$0xff]   ;;  %v605_v34 = vld [vmem:[%s1023_s1] ss:$0 sm:$0xff] }
  0x3b   : > { %v239_v0 = vld [vmem:[%s952_s11] sm:$0xff]  ;;  %405 = vmatprep.subr.bf16.mxu0 %v695_v6  ;;  %v241_v19 = vld [vmem:[%s952_s11 + $0x10] sm:$0x1]  ;;  %v240_v22 = vld [vmem:[%s952_s11 + $0x8] sm:$0xff]  ;;  %v444_v62 = vsub.s32 0, %v443_v59  ;;  %vm449_vm1 = vcmask 1047553  }
  0x3c   : > { %244 = vadd.xlane.f32.xlu0 %v239_v0  ;;  %v255_v1 = vmul.f32 %v239_v0, %v239_v0  ;;  %v249_v20 = vsel %vm248_vm0, %v241_v19, 0.0  ;;  %v257_v21 = vmul.f32 %v241_v19, %v241_v19  ;;  %v256_v24 = vmul.f32 %v240_v22, %v240_v22  ;;  %v606_v36 = vld [vmem:[%s1024_s2] ss:$0 sm:$0xff]  ;;  %s230_s14 = sand.u32 1, %s817_s19   ;;  %s632_s23 = sshll.u32 %s885_s22, 8 }
  0x3d   : > { %250 = vadd.xlane.f32.xlu1 %v249_v20  ;;  %s603_s17 = sshll.u32 %s230_s14, 4  ;;  %s977_s10 = scalar_lea.hbm %s1027_s5, %s632_s23 }
  0x3e   : > { %406 = vmatpush1.bf16.msra.mxu0 %v697_v7  ;;  %v262_v23 = vsel %vm248_vm0, %v257_v21, 0.0  ;;  %s232_s25 = scalar_lea.vmem [#allocation5], %s603_s17  ;;  %s981_s8 = scalar_lea.sflag [#allocation4], %s230_s14 }
  0x3f   : > { %407 = vmatprep.subr.bf16.mxu0 %v698_v8  ;;  %s523_s26 = sshll.u32 %s232_s25, 4  ;;  %p1038_p9 = scmp.ne.s32.totalorder %s1031_s28, 0  ;;  %s979_s26 = int_to_ptr.vmem [resolvable:$true] %s523_s26 }
  0x40   : > { %258 = vadd.xlane.f32.xlu0 %v255_v1  ;;  %s759_s22 = scalar_lea.vmem %s979_s26, 256 }
  0x41   : > { %246 = vadd.xlane.f32.xlu1 %v240_v22  ;;  %p760_p6 = scmp.ne.s32.totalorder %s979_s26, %s759_s22 }
  0x42   : > { %408 = vmatpush1.bf16.msra.mxu0 %v700_v9 }
  0x43   : > { %409 = vmatprep.subr.bf16.mxu0 %v701_v10  ;;  %p761_p10 = pnand %p760_p6, %p1038_p9 }
  0x44   : > { %263 = vadd.xlane.f32.xlu0 %v262_v23 }
  0x45   : > { %260 = vadd.xlane.f32.xlu1 %v256_v24  ;;  %p762_p12 = pneg %p761_p10 }
  0x46   : > { %410 = vmatpush1.bf16.msra.mxu0 %v703_v11 }
  0x47   : > { %411 = vmatprep.subr.bf16.mxu0 %v704_v12 }
  0x4a   : > { %412 = vmatpush1.bf16.msra.mxu0 %v706_v14 }
  0x4b   : > { %413 = vmatprep.subr.bf16.mxu0 %v707_v15 }
  0x4e   : > { %414 = vmatpush1.bf16.msra.mxu0 %v709_v16 }
  0x4f   : > { %415 = vmatprep.subr.bf16.mxu0 %v710_v17 }
  0x52   : > { %416 = vmatpush1.bf16.msra.mxu0 %v712_v18 }
  0xc9   : > { %v245_v25 = vpop.xlane.xlu0 %244 }
  0xca   : > { %v252_v26 = vmul.f32 0.03125, %v245_v25  ;;  %v251_v40 = vpop.xlane.xlu1 %250 }
  0xcb   : > { %v254_v44 = vmul.f32 0.03125, %v251_v40 }
  0xcc   : > { %v268_v28 = vmul.f32 %v252_v26, %v252_v26  ;;  %v280_v32 = vsub.f32 %v239_v0, %v252_v26  ;;  %v476_v26 = vld [vmem:[%s952_s11 + $0x1] sm:$0xff] }
  0xcd   : > { %v259_v27 = vpop.xlane.xlu0 %258  ;;  %v270_v48 = vmul.f32 %v254_v44, %v254_v44  ;;  %v282_v57 = vsub.f32 %v241_v19, %v254_v44 }
  0xce   : > { %v265_v29 = vmul.f32 0.03125, %v259_v27  ;;  %v247_v41 = vpop.xlane.xlu1 %246  ;;  %v477_v27 = vld [vmem:[%s952_s11 + $0x9] sm:$0xff]  ;;  %s831_s11 = smov [#allocation5]  }
  0xcf   : > { %v253_v42 = vmul.f32 0.03125, %v247_v41  ;;  %s763_s30 = sshll.u32 %s831_s11, 4  ;;  %s764_s30 = int_to_ptr.vmem [resolvable:$false] %s763_s30 }
  0xd0   : > { %v271_v30 = vsub.f32 %v265_v29, %v268_v28  ;;  %v497_v28 = vrot.slane %v476_v26, 7  ;;  %v498_v29 = vrot.slane %v477_v27, 7  ;;  %s765_s7 = scalar_lea.vmem %s764_s30, 512  ;;  %p766_p2 = scmp.lt.s32.totalorder %s979_s26, %s764_s30 }
  0xd1   : > { %v264_v45 = vpop.xlane.xlu0 %263  ;;  %v269_v46 = vmul.f32 %v253_v42, %v253_v42  ;;  %v281_v54 = vsub.f32 %v240_v22, %v253_v42  ;;  %p767_p3 = scmp.lt.s32.totalorder %s765_s7, %s759_s22 }
  0xd2   : > { %v274_v31 = vadd.f32 1e-05, %v271_v30  ;;  %v261_v43 = vpop.xlane.xlu1 %260  ;;  %v267_v49 = vmul.f32 0.03125, %v264_v45 }
  0xd3   : > { %v266_v47 = vmul.f32 0.03125, %v261_v43  ;;  %p768_p4 = por %p767_p3, %p766_p2 }
  0xd4   : > { %713 = vrsqrt.f32 %v274_v31  ;;  %v273_v51 = vsub.f32 %v267_v49, %v270_v48  ;;  %v626_v31 = vld [vmem:[%s1026_s4] ss:$0 sm:$0xff] }
  0xd5   : > { %v272_v50 = vsub.f32 %v266_v47, %v269_v46  ;;  %p769_p7 = pnand %p768_p4, %p762_p12 }
  0xd6   : > { %v276_v53 = vadd.f32 1e-05, %v273_v51 }
  0xd7   : > { %v275_v52 = vadd.f32 1e-05, %v272_v50 }
  0xd9   : > { %715 = vrsqrt.f32 %v275_v52 }
  0xda   : > { %717 = vrsqrt.f32 %v276_v53 }
  0xde   : > { %v714_v33 = vpop.eup %713 }
  0xdf   : > { %v283_v35 = vmul.f32 %v714_v33, %v280_v32 }
  0xe1   : > { %v292_v37 = vmul.f32 %v605_v34, %v283_v35 }
  0xe3   : > { %v301_v38 = vadd.f32 %v606_v36, %v292_v37  ;;  %v716_v56 = vpop.eup %715 }
  0xe4   : > { %v718_v58 = vpop.eup %717  ;;  %v284_v60 = vmul.f32 %v716_v56, %v281_v54 }
  0xe5   : > { %v304_v39 = vpack.c.bf16 %v301_v38, %v301_v38  ;;  %v285_v61 = vmul.f32 %v718_v58, %v282_v57 }
  0xe6   : > { %v293_v63 = vmul.f32 %v605_v34, %v284_v60 }
  0xe7   : > { %434 = vmatmul.mubr.bf16.vlgmr.msra.gmra.mrb[0].mxu0 %v304_v39  ;;  %v294_v0 = vmul.f32 %v605_v34, %v285_v61  ;;  %v499_v34 = vsel %vm248_vm0, %v497_v28, %v498_v29 }
  0xe8   : > { %v302_v4 = vadd.f32 %v606_v36, %v293_v63 }
  0xe9   : > { %v303_v10 = vadd.f32 %v606_v36, %v294_v0 }
 0x1ba   : > { %v435_v1 = vpop.f32.mrb[0].mxu0 }
 0x1bb   : > { %v445_v2 = vrot.slane %v435_v1, %v444_v62  ;;  %v437_v3 = vpop.f32.mrb[1].mxu0 }
 0x1bc   : > { %v481_v5 = vrot.slane %v437_v3, %v444_v62  ;;  %v439_v6 = vpop.f32.mrb[2].mxu0 }
 0x1bd   : > { %v440_v7 = vpop.f32.mrb[3].mxu0  ;;  %v447_v8 = vmul.f32 %v445_v2, %v302_v4  ;;  %v446_v9 = vmul.f32 %v445_v2, %v301_v38  ;;  %v448_v12 = vmul.f32 %v445_v2, %v303_v10 }
 0x1bf   : > { %453 = vadd.xlane.f32.xlu1 %v447_v8  ;;  %v450_v11 = vsel %vm449_vm1, %v446_v9, 0.0  ;;  %v455_v13 = vsel %vm248_vm0, %v448_v12, 0.0 }
 0x1c0   : > { %451 = vadd.xlane.f32.xlu0 %v450_v11 }
 0x1c4   : > { %456 = vadd.xlane.f32.xlu0 %v455_v13 }
 0x24c   : > { %v454_v14 = vpop.xlane.xlu1 %453 }
 0x24d   : > { %v624_v15 = vmul.f32 -1.442695, %v454_v14  ;;  %v452_v16 = vpop.xlane.xlu0 %451 }
 0x24e   : > { %v623_v17 = vmul.f32 -1.442695, %v452_v16 }
 0x24f   : > { %719 = vpow2.f32 %v624_v15 }
 0x250   : > { %721 = vpow2.f32 %v623_v17 }
 0x251   : > { %v457_v18 = vpop.xlane.xlu0 %456 }
 0x252   : > { %v625_v19 = vmul.f32 -1.442695, %v457_v18 }
 0x254   : > { %723 = vpow2.f32 %v625_v19 }
 0x259   : > { %v720_v20 = vpop.eup %719 }
 0x25a   : > { %v722_v21 = vpop.eup %721  ;;  %v468_v22 = vadd.f32 1.0, %v720_v20 }
 0x25b   : > { %v467_v23 = vadd.f32 1.0, %v722_v21 }
 0x25c   : > { %725 = vrcp.f32 %v468_v22 }
 0x25d   : > { %727 = vrcp.f32 %v467_v23 }
 0x25e   : > { %v724_v24 = vpop.eup %723 }
 0x25f   : > { %v469_v25 = vadd.f32 1.0, %v724_v24 }
 0x261   : > { %729 = vrcp.f32 %v469_v25 }
 0x266   : > { %v726_v30 = vpop.eup %725 }
 0x267   : > { %v728_v32 = vpop.eup %727  ;;  %v483_v33 = vmul.f32 %v726_v30, %v481_v5 }
 0x268   : > { %v482_v35 = vmul.f32 %v728_v32, %v481_v5 }
 0x269   : > { %v493_v36 = vadd.f32 %v626_v31, %v483_v33 }
 0x26a   : > { %v492_v37 = vadd.f32 %v626_v31, %v482_v35 }
 0x26b   : > { %v730_v38 = vpop.eup %729  ;;  %v504_v39 = vadd.f32 %v499_v34, %v493_v36 }
 0x26c   : > { %v503_v40 = vadd.f32 %v497_v28, %v492_v37  ;;  %v484_v41 = vmul.f32 %v730_v38, %v481_v5 }
 0x26d   : > { %507 = vst [vmem:[%s232_s25 + $0x7] sm:$0xff] %v504_v39 }
 0x26e   : > { %v494_v42 = vadd.f32 %v626_v31, %v484_v41  ;;  %506 = vst [vmem:[%s232_s25 - $0x1] sm:$0xfe] %v503_v40 }
 0x270   : > { %v505_v43 = vadd.f32 %v498_v29, %v494_v42 }
 0x272   : > { %508 = vst [vmem:[%s232_s25 + $0xf] sm:$0x1] %v505_v43 }
 0x273   : > { %772 = shalt.err (!%p769_p7)
}
 0x274   : > { %s773_s12 = scalar_lea.hbm %s977_s10, 256  ;;  %s777_s15 = scalar_lea.hbm %s1027_s5, 512 }
 0x275   : > { %p774_p8 = scmp.ne.s32.totalorder %s977_s10, %s773_s12  ;;  %p778_p1 = scmp.lt.u32.totalorder %s977_s10, %s1027_s5 }
 0x276   : > { %p779_p0 = scmp.lt.u32.totalorder %s777_s15, %s773_s12  ;;  %p781_p6 = scmp.lt.u32.totalorder %s773_s12, %s977_s10 }
 0x277   : > { %p775_p11 = pnand %p774_p8, %p1038_p9 }
 0x278   : > { %p780_p5 = por %p779_p0, %p778_p1 }
 0x279   : > { %p776_p13 = pneg %p775_p11 }
 0x27a   : > { %p782_p10 = por %p781_p6, %p780_p5 }
 0x27c   : > { %p783_p12 = pnand %p782_p10, %p776_p13 }
 0x27e   : > { %786 = shalt.err (!%p783_p12)
}
 0x27f   : > { %s832_s23 = smov 128   ;;  %s833_s25 = smov 8  }
 0x280   : > { %638 = dma.vmem_to_hbm [thread:$0]  (%p1038_p9), %s979_s26, 256, %s977_s10, %s981_s8, %s832_s23, %s832_s23, %s833_s25  }
 0x281 PF: > { %p650_p2 = scmp.ge.s32.totalorder %s825_s21, 2  ;;  %s538_s6 = sand.u32 1, %s813_s18  }
 0x282   : > { %p1039_p3 = scmp.ne.s32.totalorder %s1032_s29, 0  ;;  %s539_s9 = scalar_lea.sflag [#allocation4], %s538_s6 }
 0x284   : > { %p645_p4 = pnand %p650_p2, %p1039_p3 }
 0x286   : > { %808 = dma.done.wait (!%p645_p4), %s539_s9, 256  }
 0x287   : > { %810 = vsyncadd (!%p645_p4), %s539_s9, 4294967040  ;;  %p16_p7 = scmp.ge.s32.totalorder %s889_s24, 4   ;;  %s1040_s18 = smov %s817_s19 }
 0x288   : > { %s1041_s19 = smov %s821_s20  ;;  %s1042_s20 = smov %s900_s27 }
 0x289   : > { %s1043_s21 = smov %s889_s24  ;;  %18 = sbr.rel (!%p16_p7) target bundleno = 4 (0x4), region = 80 }
 0x290   :  { %544 = vsyncpa [#allocation3], 1 }
 0x291   :  { %546 = vsyncpa [#allocation3 + $0x1], 1 }
 0x292   :  { %547 = vsyncpa [#allocation4], 1 }
 0x293   :  { %549 = vsyncpa [#allocation4 + $0x1], 1 }

// kernel: tpu_custom_call.1
= control target key start
LH: loop header
LB: loop body
LE: loop exit
PB: predicated region body
PF: predicated region fallthrough
CT: control target
= control target key end

     0   :  { %10 = vsyncpa [#allocation3], 0  ;;  %s1022_s0 = inlined_call_operand.vmem [shape: f32[2,18,128], index: 0, kind: input, shape index: {}]   ;;  %s1023_s1 = inlined_call_operand.vmem [shape: f32[1,128], index: 1, kind: input, shape index: {}]   ;;  %s1024_s2 = inlined_call_operand.vmem [shape: f32[1,128], index: 2, kind: input, shape index: {}]   ;;  %s1025_s3 = inlined_call_operand.hbm [shape: bf16[128,256], index: 3, kind: input, shape index: {}]   ;;  %s1026_s4 = inlined_call_operand.vmem [shape: f32[1,128], index: 4, kind: input, shape index: {}]   ;;  %s1027_s5 = inlined_call_operand.hbm [shape: f32[2,16,128], index: 5, kind: output, shape index: {}]  }
   0x1   :  { %11 = vsyncpa [#allocation4], 0 }
   0x2   :  { %13 = vsyncpa [#allocation4 + $0x1], 0  ;;  %s864_s18 = smov 0   ;;  %s866_s19 = smov 0  }
   0x3   :  { %s868_s20 = smov 0   ;;  %s870_s21 = smov 0  }
   0x4 LB: > { %s885_s22 = sadd.s32 4294967295, %s825_s21   ;;  %s597_s23 = sadd.s32 4294967294, %s825_s21   ;;  %s825_s21 = sphi %s870_s21, %s1043_s21   ;;  %s821_s20 = sphi %s868_s20, %s1042_s20   ;;  %s817_s19 = sphi %s866_s19, %s1041_s19   ;;  %s813_s18 = sphi %s864_s18, %s1040_s18  }
   0x5   : > { %s889_s24 = sadd.s32 1, %s825_s21   ;;  %s136_s25 = sadd.s32 1, %s821_s20 }
   0x6   : > { %s133_s26 = ssub.s32 %s825_s21, %s889_s24  ;;  %p146_p0 = scmp.ne.s32.totalorder %s821_s20, %s817_s19 }
   0x7   : > { %p134_p1 = scmp.eq.s32.totalorder %s133_s26, 0  ;;  %p147_p2 = scmp.eq.s32.totalorder %s885_s22, 1 }
   0x8   : > { %p152_p3 = scmp.ne.s32.totalorder %s817_s19, %s813_s18  ;;  %p153_p4 = scmp.eq.s32.totalorder %s597_s23, 1 }
   0x9   : > { %s900_s27 = scalar_select %p134_p1, %s821_s20, %s136_s25  }
   0xa   : > { %p902_p5 = por %p147_p2, %p146_p0  ;;  %p906_p6 = por %p153_p4, %p152_p3 }
   0xb   : > { %p598_p7 = scmp.ge.s32.totalorder %s825_s21, 1  ;;  %p160_p8 = scmp.lt.s32.totalorder %s825_s21, 3 }
   0xc   : > { %s1031_s28 = scalar_select %p902_p5, 1, 0 }
   0xd   : > { %s1032_s29 = scalar_select %p906_p6, 1, 0 }
   0xe   : > { %p1028_p9 = scmp.eq.s32.totalorder %s885_s22, 0  ;;  %p913_p10 = pnand %p598_p7, %p160_p8 }
   0xf   : > { %s827_s6 = smov [#allocation2]   ;;  %s731_s11 = scalar_lea.hbm %s1025_s3, 2048 }
  0x10   : > { %s1033_s30 = scalar_select %p913_p10, 1, 0 }
  0x11   : > { %s178_s7 = sshll.u32 %s827_s6, 4  ;;  %p640_p11 = pneg %p913_p10  ;;  %s179_s7 = int_to_ptr.vmem [resolvable:$true] %s178_s7 }
  0x12   : > { %p732_p13 = scmp.ne.s32.totalorder %s1025_s3, %s731_s11  ;;  %p738_p3 = scmp.lt.u32.totalorder %s731_s11, %s1025_s3 }
  0x13   : > { %p921_p12 = pnand %p1028_p9, %p640_p11 }
  0x15   : > { %p733_p0 = pneg %p921_p12 }
  0x17   : > { %p734_p1 = pnand %p733_p0, %p732_p13 }
  0x19   : > { %p735_p2 = pneg %p734_p1 }
  0x1b   : > { %p740_p4 = pnand %p738_p3, %p735_p2 }
  0x1d   : > { %743 = shalt.err (!%p740_p4)
}
  0x1e   : > { %s744_s16 = scalar_lea.vmem %s179_s7, 2048  ;;  %p752_p9 = scmp.lt.s32.totalorder %s179_s7, %s179_s7 }
  0x1f   : > { %p745_p7 = scmp.ne.s32.totalorder %s179_s7, %s744_s16  ;;  %p753_p6 = scmp.lt.s32.totalorder %s744_s16, %s744_s16 }
  0x21   : > { %p747_p8 = pnand %p745_p7, %p733_p0  ;;  %p754_p5 = por %p753_p6, %p752_p9 }
  0x23   : > { %p748_p11 = pneg %p747_p8 }
  0x25   : > { %p755_p10 = pnand %p754_p5, %p748_p11 }
  0x27   : > { %758 = shalt.err (!%p755_p10)
}
  0x28   : > { %s828_s17 = smov 128   ;;  %s829_s23 = smov 8  }
  0x29   : > { %643 = dma.hbm_to_vmem [thread:$0]  (!%p921_p12), %s1025_s3, 2048, %s179_s7, [#allocation3], %s828_s17, %s828_s17, %s829_s23  }
  0x2a   : > { %p1035_p13 = scmp.ne.s32.totalorder %s1033_s30, 0 }
  0x2b   : > { %p1036_p1 = scmp.eq.s32.totalorder (!%p1035_p13), %s885_s22, 0 }
  0x2c   : > { %205 = sbr.rel (%p1035_p13) target bundleno = 641 (0x281), region = 40 }
  0x33   : > { %804 = dma.done.wait (%p1036_p1), [#allocation3], 2048   ;;  %p1037_p0 = pmov %p1036_p1 }
  0x34   : > { %p233_p5 = scmp.lt.s32.totalorder %s885_s22, 1  ;;  %v689_v2 = vld [vmem:[#allocation2 + $0x4] ss:$8 sps:$4 sm:$0xff]   ;;  %v691_v3 = vld [vmem:[#allocation2] ss:$8 sps:$4 sm:$0xff]   ;;  %v830_v13 = vmov 0   ;;  %v442_v55 = vlaneseq }
  0x35   : > { %806 = vsyncadd (%p1037_p0), [#allocation3], 4294965248  ;;  %401 = vmatprep.subr.bf16.mxu0 %v689_v2  ;;  %v692_v4 = vld [vmem:[#allocation2 + $0x14] ss:$8 sps:$4 sm:$0xff]   ;;  %v694_v5 = vld [vmem:[#allocation2 + $0x10] ss:$8 sps:$4 sm:$0xff]   ;;  %433 = vmatprep.mubr.bf16.mxu0 %v830_v13 }
  0x36   : > { %s234_s6 = scalar_select %p233_p5, %s885_s22, 1  ;;  %402 = vmatpush1.bf16.msra.mxu0 %v691_v3  ;;  %v695_v6 = vld [vmem:[#allocation2 + $0x24] ss:$8 sps:$4 sm:$0xff]   ;;  %v697_v7 = vld [vmem:[#allocation2 + $0x20] ss:$8 sps:$4 sm:$0xff]   ;;  %vm248_vm0 = vcmask 1040384  }
  0x37   : > { %403 = vmatprep.subr.bf16.mxu0 %v692_v4  ;;  %v698_v8 = vld [vmem:[#allocation2 + $0x34] ss:$8 sps:$4 sm:$0xff]   ;;  %v700_v9 = vld [vmem:[#allocation2 + $0x30] ss:$8 sps:$4 sm:$0xff]   ;;  %v701_v10 = vld [vmem:[#allocation2 + $0x44] ss:$8 sps:$4 sm:$0xff]  }
  0x38   : > { %s633_s9 = smul.u32 24, %s234_s6  ;;  %v703_v11 = vld [vmem:[#allocation2 + $0x40] ss:$8 sps:$4 sm:$0xff]   ;;  %v704_v12 = vld [vmem:[#allocation2 + $0x54] ss:$8 sps:$4 sm:$0xff]   ;;  %v443_v59 = vshrl.u32 %v442_v55, 7 }
  0x39   : > { %v706_v14 = vld [vmem:[#allocation2 + $0x50] ss:$8 sps:$4 sm:$0xff]   ;;  %v707_v15 = vld [vmem:[#allocation2 + $0x64] ss:$8 sps:$4 sm:$0xff]   ;;  %v709_v16 = vld [vmem:[#allocation2 + $0x60] ss:$8 sps:$4 sm:$0xff]  }
  0x3a   : > { %s952_s11 = scalar_lea.vmem %s1022_s0, %s633_s9  ;;  %404 = vmatpush1.bf16.msra.mxu0 %v694_v5  ;;  %v710_v17 = vld [vmem:[#allocation2 + $0x74] ss:$8 sps:$4 sm:$0xff]   ;;  %v712_v18 = vld [vmem:[#allocation2 + $0x70] ss:$8 sps:$4 sm:$0xff]   ;;  %v605_v34 = vld [vmem:[%s1023_s1] ss:$0 sm:$0xff] }
  0x3b   : > { %v239_v0 = vld [vmem:[%s952_s11] sm:$0xff]  ;;  %405 = vmatprep.subr.bf16.mxu0 %v695_v6  ;;  %v241_v19 = vld [vmem:[%s952_s11 + $0x10] sm:$0x1]  ;;  %v240_v22 = vld [vmem:[%s952_s11 + $0x8] sm:$0xff]  ;;  %v444_v62 = vsub.s32 0, %v443_v59  ;;  %vm449_vm1 = vcmask 1047553  }
  0x3c   : > { %244 = vadd.xlane.f32.xlu0 %v239_v0  ;;  %v255_v1 = vmul.f32 %v239_v0, %v239_v0  ;;  %v249_v20 = vsel %vm248_vm0, %v241_v19, 0.0  ;;  %v257_v21 = vmul.f32 %v241_v19, %v241_v19  ;;  %v256_v24 = vmul.f32 %v240_v22, %v240_v22  ;;  %v606_v36 = vld [vmem:[%s1024_s2] ss:$0 sm:$0xff]  ;;  %s230_s14 = sand.u32 1, %s817_s19   ;;  %s632_s23 = sshll.u32 %s885_s22, 8 }
  0x3d   : > { %250 = vadd.xlane.f32.xlu1 %v249_v20  ;;  %s603_s17 = sshll.u32 %s230_s14, 4  ;;  %s977_s10 = scalar_lea.hbm %s1027_s5, %s632_s23 }
  0x3e   : > { %406 = vmatpush1.bf16.msra.mxu0 %v697_v7  ;;  %v262_v23 = vsel %vm248_vm0, %v257_v21, 0.0  ;;  %s232_s25 = scalar_lea.vmem [#allocation5], %s603_s17  ;;  %s981_s8 = scalar_lea.sflag [#allocation4], %s230_s14 }
  0x3f   : > { %407 = vmatprep.subr.bf16.mxu0 %v698_v8  ;;  %s523_s26 = sshll.u32 %s232_s25, 4  ;;  %p1038_p9 = scmp.ne.s32.totalorder %s1031_s28, 0  ;;  %s979_s26 = int_to_ptr.vmem [resolvable:$true] %s523_s26 }
  0x40   : > { %258 = vadd.xlane.f32.xlu0 %v255_v1  ;;  %s759_s22 = scalar_lea.vmem %s979_s26, 256 }
  0x41   : > { %246 = vadd.xlane.f32.xlu1 %v240_v22  ;;  %p760_p6 = scmp.ne.s32.totalorder %s979_s26, %s759_s22 }
  0x42   : > { %408 = vmatpush1.bf16.msra.mxu0 %v700_v9 }
  0x43   : > { %409 = vmatprep.subr.bf16.mxu0 %v701_v10  ;;  %p761_p10 = pnand %p760_p6, %p1038_p9 }
  0x44   : > { %263 = vadd.xlane.f32.xlu0 %v262_v23 }
  0x45   : > { %260 = vadd.xlane.f32.xlu1 %v256_v24  ;;  %p762_p12 = pneg %p761_p10 }
  0x46   : > { %410 = vmatpush1.bf16.msra.mxu0 %v703_v11 }
  0x47   : > { %411 = vmatprep.subr.bf16.mxu0 %v704_v12 }
  0x4a   : > { %412 = vmatpush1.bf16.msra.mxu0 %v706_v14 }
  0x4b   : > { %413 = vmatprep.subr.bf16.mxu0 %v707_v15 }
  0x4e   : > { %414 = vmatpush1.bf16.msra.mxu0 %v709_v16 }
  0x4f   : > { %415 = vmatprep.subr.bf16.mxu0 %v710_v17 }
  0x52   : > { %416 = vmatpush1.bf16.msra.mxu0 %v712_v18 }
  0xc9   : > { %v245_v25 = vpop.xlane.xlu0 %244 }
  0xca   : > { %v252_v26 = vmul.f32 0.03125, %v245_v25  ;;  %v251_v40 = vpop.xlane.xlu1 %250 }
  0xcb   : > { %v254_v44 = vmul.f32 0.03125, %v251_v40 }
  0xcc   : > { %v268_v28 = vmul.f32 %v252_v26, %v252_v26  ;;  %v280_v32 = vsub.f32 %v239_v0, %v252_v26  ;;  %v476_v26 = vld [vmem:[%s952_s11 + $0x1] sm:$0xff] }
  0xcd   : > { %v259_v27 = vpop.xlane.xlu0 %258  ;;  %v270_v48 = vmul.f32 %v254_v44, %v254_v44  ;;  %v282_v57 = vsub.f32 %v241_v19, %v254_v44 }
  0xce   : > { %v265_v29 = vmul.f32 0.03125, %v259_v27  ;;  %v247_v41 = vpop.xlane.xlu1 %246  ;;  %v477_v27 = vld [vmem:[%s952_s11 + $0x9] sm:$0xff]  ;;  %s831_s11 = smov [#allocation5]  }
  0xcf   : > { %v253_v42 = vmul.f32 0.03125, %v247_v41  ;;  %s763_s30 = sshll.u32 %s831_s11, 4  ;;  %s764_s30 = int_to_ptr.vmem [resolvable:$false] %s763_s30 }
  0xd0   : > { %v271_v30 = vsub.f32 %v265_v29, %v268_v28  ;;  %v497_v28 = vrot.slane %v476_v26, 7  ;;  %v498_v29 = vrot.slane %v477_v27, 7  ;;  %s765_s7 = scalar_lea.vmem %s764_s30, 512  ;;  %p766_p2 = scmp.lt.s32.totalorder %s979_s26, %s764_s30 }
  0xd1   : > { %v264_v45 = vpop.xlane.xlu0 %263  ;;  %v269_v46 = vmul.f32 %v253_v42, %v253_v42  ;;  %v281_v54 = vsub.f32 %v240_v22, %v253_v42  ;;  %p767_p3 = scmp.lt.s32.totalorder %s765_s7, %s759_s22 }
  0xd2   : > { %v274_v31 = vadd.f32 1e-05, %v271_v30  ;;  %v261_v43 = vpop.xlane.xlu1 %260  ;;  %v267_v49 = vmul.f32 0.03125, %v264_v45 }
  0xd3   : > { %v266_v47 = vmul.f32 0.03125, %v261_v43  ;;  %p768_p4 = por %p767_p3, %p766_p2 }
  0xd4   : > { %713 = vrsqrt.f32 %v274_v31  ;;  %v273_v51 = vsub.f32 %v267_v49, %v270_v48  ;;  %v626_v31 = vld [vmem:[%s1026_s4] ss:$0 sm:$0xff] }
  0xd5   : > { %v272_v50 = vsub.f32 %v266_v47, %v269_v46  ;;  %p769_p7 = pnand %p768_p4, %p762_p12 }
  0xd6   : > { %v276_v53 = vadd.f32 1e-05, %v273_v51 }
  0xd7   : > { %v275_v52 = vadd.f32 1e-05, %v272_v50 }
  0xd9   : > { %715 = vrsqrt.f32 %v275_v52 }
  0xda   : > { %717 = vrsqrt.f32 %v276_v53 }
  0xde   : > { %v714_v33 = vpop.eup %713 }
  0xdf   : > { %v283_v35 = vmul.f32 %v714_v33, %v280_v32 }
  0xe1   : > { %v292_v37 = vmul.f32 %v605_v34, %v283_v35 }
  0xe3   : > { %v301_v38 = vadd.f32 %v606_v36, %v292_v37  ;;  %v716_v56 = vpop.eup %715 }
  0xe4   : > { %v718_v58 = vpop.eup %717  ;;  %v284_v60 = vmul.f32 %v716_v56, %v281_v54 }
  0xe5   : > { %v304_v39 = vpack.c.bf16 %v301_v38, %v301_v38  ;;  %v285_v61 = vmul.f32 %v718_v58, %v282_v57 }
  0xe6   : > { %v293_v63 = vmul.f32 %v605_v34, %v284_v60 }
  0xe7   : > { %434 = vmatmul.mubr.bf16.vlgmr.msra.gmra.mrb[0].mxu0 %v304_v39  ;;  %v294_v0 = vmul.f32 %v605_v34, %v285_v61  ;;  %v499_v34 = vsel %vm248_vm0, %v497_v28, %v498_v29 }
  0xe8   : > { %v302_v4 = vadd.f32 %v606_v36, %v293_v63 }
  0xe9   : > { %v303_v10 = vadd.f32 %v606_v36, %v294_v0 }
 0x1ba   : > { %v435_v1 = vpop.f32.mrb[0].mxu0 }
 0x1bb   : > { %v445_v2 = vrot.slane %v435_v1, %v444_v62  ;;  %v437_v3 = vpop.f32.mrb[1].mxu0 }
 0x1bc   : > { %v481_v5 = vrot.slane %v437_v3, %v444_v62  ;;  %v439_v6 = vpop.f32.mrb[2].mxu0 }
 0x1bd   : > { %v440_v7 = vpop.f32.mrb[3].mxu0  ;;  %v447_v8 = vmul.f32 %v445_v2, %v302_v4  ;;  %v446_v9 = vmul.f32 %v445_v2, %v301_v38  ;;  %v448_v12 = vmul.f32 %v445_v2, %v303_v10 }
 0x1bf   : > { %453 = vadd.xlane.f32.xlu1 %v447_v8  ;;  %v450_v11 = vsel %vm449_vm1, %v446_v9, 0.0  ;;  %v455_v13 = vsel %vm248_vm0, %v448_v12, 0.0 }
 0x1c0   : > { %451 = vadd.xlane.f32.xlu0 %v450_v11 }
 0x1c4   : > { %456 = vadd.xlane.f32.xlu0 %v455_v13 }
 0x24c   : > { %v454_v14 = vpop.xlane.xlu1 %453 }
 0x24d   : > { %v624_v15 = vmul.f32 -1.442695, %v454_v14  ;;  %v452_v16 = vpop.xlane.xlu0 %451 }
 0x24e   : > { %v623_v17 = vmul.f32 -1.442695, %v452_v16 }
 0x24f   : > { %719 = vpow2.f32 %v624_v15 }
 0x250   : > { %721 = vpow2.f32 %v623_v17 }
 0x251   : > { %v457_v18 = vpop.xlane.xlu0 %456 }
 0x252   : > { %v625_v19 = vmul.f32 -1.442695, %v457_v18 }
 0x254   : > { %723 = vpow2.f32 %v625_v19 }
 0x259   : > { %v720_v20 = vpop.eup %719 }
 0x25a   : > { %v722_v21 = vpop.eup %721  ;;  %v468_v22 = vadd.f32 1.0, %v720_v20 }
 0x25b   : > { %v467_v23 = vadd.f32 1.0, %v722_v21 }
 0x25c   : > { %725 = vrcp.f32 %v468_v22 }
 0x25d   : > { %727 = vrcp.f32 %v467_v23 }
 0x25e   : > { %v724_v24 = vpop.eup %723 }
 0x25f   : > { %v469_v25 = vadd.f32 1.0, %v724_v24 }
 0x261   : > { %729 = vrcp.f32 %v469_v25 }
 0x266   : > { %v726_v30 = vpop.eup %725 }
 0x267   : > { %v728_v32 = vpop.eup %727  ;;  %v483_v33 = vmul.f32 %v726_v30, %v481_v5 }
 0x268   : > { %v482_v35 = vmul.f32 %v728_v32, %v481_v5 }
 0x269   : > { %v493_v36 = vadd.f32 %v626_v31, %v483_v33 }
 0x26a   : > { %v492_v37 = vadd.f32 %v626_v31, %v482_v35 }
 0x26b   : > { %v730_v38 = vpop.eup %729  ;;  %v504_v39 = vadd.f32 %v499_v34, %v493_v36 }
 0x26c   : > { %v503_v40 = vadd.f32 %v497_v28, %v492_v37  ;;  %v484_v41 = vmul.f32 %v730_v38, %v481_v5 }
 0x26d   : > { %507 = vst [vmem:[%s232_s25 + $0x7] sm:$0xff] %v504_v39 }
 0x26e   : > { %v494_v42 = vadd.f32 %v626_v31, %v484_v41  ;;  %506 = vst [vmem:[%s232_s25 - $0x1] sm:$0xfe] %v503_v40 }
 0x270   : > { %v505_v43 = vadd.f32 %v498_v29, %v494_v42 }
 0x272   : > { %508 = vst [vmem:[%s232_s25 + $0xf] sm:$0x1] %v505_v43 }
 0x273   : > { %772 = shalt.err (!%p769_p7)
}
 0x274   : > { %s773_s12 = scalar_lea.hbm %s977_s10, 256  ;;  %s777_s15 = scalar_lea.hbm %s1027_s5, 512 }
 0x275   : > { %p774_p8 = scmp.ne.s32.totalorder %s977_s10, %s773_s12  ;;  %p778_p1 = scmp.lt.u32.totalorder %s977_s10, %s1027_s5 }
 0x276   : > { %p779_p0 = scmp.lt.u32.totalorder %s777_s15, %s773_s12  ;;  %p781_p6 = scmp.lt.u32.totalorder %s773_s12, %s977_s10 }
 0x277   : > { %p775_p11 = pnand %p774_p8, %p1038_p9 }
 0x278   : > { %p780_p5 = por %p779_p0, %p778_p1 }
 0x279   : > { %p776_p13 = pneg %p775_p11 }
 0x27a   : > { %p782_p10 = por %p781_p6, %p780_p5 }
 0x27c   : > { %p783_p12 = pnand %p782_p10, %p776_p13 }
 0x27e   : > { %786 = shalt.err (!%p783_p12)
}
 0x27f   : > { %s832_s23 = smov 128   ;;  %s833_s25 = smov 8  }
 0x280   : > { %638 = dma.vmem_to_hbm [thread:$0]  (%p1038_p9), %s979_s26, 256, %s977_s10, %s981_s8, %s832_s23, %s832_s23, %s833_s25  }
 0x281 PF: > { %p650_p2 = scmp.ge.s32.totalorder %s825_s21, 2  ;;  %s538_s6 = sand.u32 1, %s813_s18  }
 0x282   : > { %p1039_p3 = scmp.ne.s32.totalorder %s1032_s29, 0  ;;  %s539_s9 = scalar_lea.sflag [#allocation4], %s538_s6 }
 0x284   : > { %p645_p4 = pnand %p650_p2, %p1039_p3 }
 0x286   : > { %808 = dma.done.wait (!%p645_p4), %s539_s9, 256  }
 0x287   : > { %810 = vsyncadd (!%p645_p4), %s539_s9, 4294967040  ;;  %p16_p7 = scmp.ge.s32.totalorder %s889_s24, 4   ;;  %s1040_s18 = smov %s817_s19 }
 0x288   : > { %s1041_s19 = smov %s821_s20  ;;  %s1042_s20 = smov %s900_s27 }
 0x289   : > { %s1043_s21 = smov %s889_s24  ;;  %18 = sbr.rel (!%p16_p7) target bundleno = 4 (0x4), region = 80 }
 0x290   :  { %544 = vsyncpa [#allocation3], 1 }
 0x291   :  { %546 = vsyncpa [#allocation3 + $0x1], 1 }
 0x292   :  { %547 = vsyncpa [#allocation4], 1 }
 0x293   :  { %549 = vsyncpa [#allocation4 + $0x1], 1 }

</bundles_post_ra>
